<compile_context>
chip_gen: v7x
topology: tpu7x:2x2x1
jax: 0.10.0
libtpu: 0.0.40
codegen_flags: <defaults>
</compile_context>

<pallas_src>
import functools

import numpy as np

import jax
import jax.numpy as jnp
from jax import lax
from jax.experimental import pallas as pl
from jax.experimental.pallas import tpu as pltpu


# ----------------------------------------------------------------------------
# Fused Pallas kernel: conv1 + AmI + ReLU + conv2 + AmI, all in VMEM/vregs.
# ----------------------------------------------------------------------------
def fused_ami_forward_kernel(x_ref, w1_ref, w2_ref, masks_ref, aux_ref, o_ref,
                             *, H, W, num_groups, inv_wp, sp0, inv_sp1):
    """Shapes:
      x_ref:     (Cin, HW)      input image, spatial flattened onto lanes
      w1_ref:    (C1, 9*Cin)    conv1 weight, im2col layout (tap-major, cin-minor)
      w2_ref:    (C2, 9*C1)     conv2 weight, im2col layout
      masks_ref: (9, HW)        precomputed 'same'-padding border masks per tap
      aux_ref:   (C, 4+G)       [b1 | b2 | attri multiplicity | weaken mask |
                                 strengthen-group masks]
      o_ref:     (C2, HW)
    """
    HW = H * W
    masks = masks_ref[...]                       # (9, HW)
    aux = aux_ref[...]                           # (C, 4+G)
    b1 = aux[:, 0:1]
    b2 = aux[:, 1:2]
    cnt = aux[:, 2:3]                            # attribution-neuron multiplicity
    weaken_n = aux[:, 3:4]                       # weaken_neurons mask

    tap_offsets = tuple(dh * W + dw for dh in (-1, 0, 1) for dw in (-1, 0, 1))

    def im2col(a):
        # a: (C, HW) -> (9*C, HW); row ordering tap*C + c matches the wrapper's
        # (Cout, kh, kw, Cin) weight flattening.  Circular wrap from the roll
        # is harmless because the per-tap border mask zeroes every wrapped lane.
        rows = []
        for t, off in enumerate(tap_offsets):
            shifted = a if off == 0 else pltpu.roll(a, shift=(-off) % HW, axis=1)
            rows.append(shifted * masks[t:t + 1, :])
        return jnp.concatenate(rows, axis=0)

    def conv3x3(a, w_flat, b):
        # Single MXU push per conv: (Cout, 9*Cin) @ (9*Cin, HW).
        return jnp.dot(w_flat, im2col(a), preferred_element_type=jnp.float32) + b

    # ---- AmI gate (neuron_AmI); layer-invariant masks loaded once. ----
    def ami(v):
        data = jnp.sum(v, axis=1, keepdims=True)        # (C, 1) lane reduce
        n_attri = jnp.sum(cnt)
        mean = jnp.sum(data * cnt) / n_attri
        # std(unbiased=False), exactly as written in neuron_AmI.
        var = jnp.sum(cnt * (data - mean) ** 2) / n_attri
        std = jnp.sqrt(var)
        amin = jnp.min(jnp.where(cnt > 0, data, jnp.inf))
        std_nz = std != 0.0
        # One scalar reciprocal, then multiplies (0 when std == 0, matching the
        # "deviation stays zero" branch of the PyTorch code).
        inv_std = jnp.where(std_nz, 1.0 / jnp.where(std_nz, std, 1.0), 0.0)
        dev_w = jnp.maximum(0.0, (data - mean) * inv_std)
        wkn = jnp.exp(-dev_w * inv_wp) * weaken_n
        dev_s = jnp.abs(data - amin) * inv_std
        st_val = sp0 - jnp.exp(-dev_s * inv_sp1)        # (C, 1)
        stn = jnp.ones_like(st_val)
        for g in range(num_groups):                     # static unroll
            m = aux[:, 4 + g:5 + g]
            stn = stn * (st_val * m + (1.0 - m))
        stn = stn * (1.0 - weaken_n) + wkn
        return v * stn                                  # per-row broadcast

    # ---- Fused forward: conv1 -> AmI -> ReLU -> conv2 -> AmI. ----
    h1 = conv3x3(x_ref[...], w1_ref[...], b1)
    h1 = jnp.maximum(ami(h1), 0.0)   # ReLU leaf's hook has empty ami_data -> identity
    h2 = conv3x3(h1, w2_ref[...], b2)
    o_ref[...] = ami(h2)


# ----------------------------------------------------------------------------
# Wrapper: one-time layout plumbing + a single pallas_call.
# ----------------------------------------------------------------------------
def ami_model_forward(x_nchw, params, ami_cfg):
    assert x_nchw.shape[0] == 1, "neuron_AmI squeezes the batch dim (N=1)"
    _, cin, h, w = x_nchw.shape
    c1 = params["w1"].shape[0]
    c2 = params["w2"].shape[0]
    assert c1 == c2, "AmI gate masks are shared across both conv outputs here"
    hw = h * w
    g = ami_cfg["strengthen_masks"].shape[0]

    # One-time, tiny, layout-only parameter prep.
    x_flat = x_nchw[0].reshape(cin, hw)                                # free reshape
    # im2col weights: (Cout, Cin, 3, 3) -> (Cout, kh, kw, Cin) -> (Cout, 9*Cin).
    w1_flat = jnp.transpose(params["w1"], (0, 2, 3, 1)).reshape(c1, 9 * cin)
    w2_flat = jnp.transpose(params["w2"], (0, 2, 3, 1)).reshape(c2, 9 * c1)

    # Constant 'same'-padding border masks for the 9 taps (host-side, static).
    li = np.arange(hw)
    hi, wi = li // w, li % w
    masks_np = np.stack(
        [(((hi + dh) >= 0) & ((hi + dh) < h) & ((wi + dw) >= 0) & ((wi + dw) < w))
         for dh in (-1, 0, 1) for dw in (-1, 0, 1)]).astype(np.float32)
    masks = jnp.asarray(masks_np)                                      # (9, HW)

    # Pack all tiny lane-sparse per-channel operands into ONE (C, 4+G) array.
    aux = jnp.concatenate(
        [params["b1"].reshape(c1, 1),
         params["b2"].reshape(c2, 1),
         ami_cfg["attri_cnt"].reshape(c1, 1),
         ami_cfg["weaken_n"].reshape(c1, 1),
         ami_cfg["strengthen_masks"].T], axis=1).astype(jnp.float32)

    kernel = functools.partial(
        fused_ami_forward_kernel, H=h, W=w, num_groups=g,
        inv_wp=1.0 / float(ami_cfg["weaken_param"]),
        sp0=float(ami_cfg["sp0"]),
        inv_sp1=1.0 / float(ami_cfg["sp1"]))

    vmem = pl.BlockSpec(memory_space=pltpu.MemorySpace.VMEM)
    out = pl.pallas_call(
        kernel,
        out_shape=jax.ShapeDtypeStruct((c2, hw), jnp.float32),
        in_specs=[vmem] * 5,
        out_specs=vmem,
    )(x_flat, w1_flat, w2_flat, masks, aux)
    return out.reshape(1, c2, h, w)


# ----------------------------------------------------------------------------
# Pure-JAX reference (mirrors the PyTorch code) for correctness checking.
# ----------------------------------------------------------------------------
def neuron_ami_ref(x_chw, attri_idx, weaken_n, strengthen_masks, wp, sp0, sp1):
    data = x_chw.sum(axis=(1, 2))
    attri = data[jnp.asarray(attri_idx)]
    mean = attri.mean()
    std = jnp.sqrt(((attri - mean) ** 2).mean())          # unbiased=False
    amin = attri.min()
    safe = jnp.where(std != 0, std, 1.0)
    dev_w = jnp.where(std != 0, jnp.maximum(0.0, (data - mean) / safe), 0.0)
    wkn = jnp.exp(-dev_w / wp) * weaken_n
    dev_s = jnp.where(std != 0, jnp.abs(data - amin) / safe, 0.0)
    stn = jnp.ones_like(data)
    for g in range(strengthen_masks.shape[0]):
        m = strengthen_masks[g]
        stn = stn * ((sp0 - jnp.exp(-dev_s / sp1)) * m + (1.0 - m))
    stn = stn * (1.0 - weaken_n) + wkn
    return x_chw * stn[:, None, None]


def forward_ref(x_nchw, params, ami_cfg, attri_idx):
    dn = ("NCHW", "OIHW", "NCHW")
    wp, sp0, sp1 = ami_cfg["weaken_param"], ami_cfg["sp0"], ami_cfg["sp1"]
    h1 = lax.conv_general_dilated(x_nchw, params["w1"], (1, 1), "SAME",
                                  dimension_numbers=dn) + params["b1"][None, :, None, None]
    h1 = neuron_ami_ref(h1[0], attri_idx, ami_cfg["weaken_n"],
                        ami_cfg["strengthen_masks"], wp, sp0, sp1)[None]
    h1 = jnp.maximum(h1, 0.0)
    h2 = lax.conv_general_dilated(h1, params["w2"], (1, 1), "SAME",
                                  dimension_numbers=dn) + params["b2"][None, :, None, None]
    h2 = neuron_ami_ref(h2[0], attri_idx, ami_cfg["weaken_n"],
                        ami_cfg["strengthen_masks"], wp, sp0, sp1)[None]
    return h2


# ----------------------------------------------------------------------------
# Main
# ----------------------------------------------------------------------------
if __name__ == "__main__":
    key = jax.random.PRNGKey(0)
    k_x, k_w1, k_b1, k_w2, k_b2 = jax.random.split(key, 5)

    N, CIN, C, H, W = 1, 4, 8, 16, 16
    x = jax.random.normal(k_x, (N, CIN, H, W), dtype=jnp.float32)

    params = {
        "w1": jax.random.normal(k_w1, (C, CIN, 3, 3), dtype=jnp.float32) * 0.2,
        "b1": jax.random.normal(k_b1, (C,), dtype=jnp.float32) * 0.1,
        "w2": jax.random.normal(k_w2, (C, C, 3, 3), dtype=jnp.float32) * 0.2,
        "b2": jax.random.normal(k_b2, (C,), dtype=jnp.float32) * 0.1,
    }

    # Synthetic ami_data: two strengthen groups (as built in Hook.hook_fn).
    group_lists = [[0, 3], [5]]
    attri_idx = [i for grp in group_lists for i in grp]
    strengthen_masks = jnp.stack(
        [jnp.zeros((C,), jnp.float32).at[jnp.asarray(grp)].set(1.0)
         for grp in group_lists])
    weaken_n = jnp.ones((C,), jnp.float32)
    for gi in range(strengthen_masks.shape[0]):
        weaken_n = weaken_n * (1.0 - strengthen_masks[gi])
    attri_cnt = jnp.zeros((C,), jnp.float32)
    for i in attri_idx:
        attri_cnt = attri_cnt.at[i].add(1.0)

    ami_cfg = {
        "weaken_param": 2.0,      # set_ami_params(...)
        "sp0": 1.0,
        "sp1": 3.0,
        "attri_cnt": attri_cnt,
        "weaken_n": weaken_n,
        "strengthen_masks": strengthen_masks,
    }

    out = ami_model_forward(x, params, ami_cfg)
    out = jax.block_until_ready(out)

    ref = forward_ref(x, params, ami_cfg, attri_idx)
    assert out.shape == (N, C, H, W)
    assert jnp.allclose(out, ref, rtol=1e-4, atol=1e-4), "mismatch vs reference"

    print("KERNEL_OK")
</pallas_src>

<mosaic_0001>
module attributes {stable_mosaic.version = 11 : i64} {
  func.func @fused_ami_forward_kernel(%arg0: memref<4x256xf32, #tpu.memory_space<vmem>>, %arg1: memref<8x36xf32, #tpu.memory_space<vmem>>, %arg2: memref<8x72xf32, #tpu.memory_space<vmem>>, %arg3: memref<9x256xf32, #tpu.memory_space<vmem>>, %arg4: memref<8x6xf32, #tpu.memory_space<vmem>>, %arg5: memref<8x256xf32, #tpu.memory_space<vmem>>) attributes {dimension_semantics = [], scalar_prefetch = 0 : i64, scratch_operands = 0 : i64, tpu.core_type = #tpu.core_type<tc>} {
    %c0 = arith.constant 0 : index
    %c0_0 = arith.constant 0 : index
    %0 = vector.load %arg3[%c0, %c0_0] : memref<9x256xf32, #tpu.memory_space<vmem>>, vector<9x256xf32>
    %c0_1 = arith.constant 0 : index
    %c0_2 = arith.constant 0 : index
    %1 = vector.load %arg4[%c0_1, %c0_2] : memref<8x6xf32, #tpu.memory_space<vmem>>, vector<8x6xf32>
    %2 = vector.extract_strided_slice %1 {offsets = [0, 0], sizes = [8, 1], strides = [1, 1]} : vector<8x6xf32> to vector<8x1xf32>
    %3 = vector.extract_strided_slice %1 {offsets = [0, 1], sizes = [8, 1], strides = [1, 1]} : vector<8x6xf32> to vector<8x1xf32>
    %4 = vector.extract_strided_slice %1 {offsets = [0, 2], sizes = [8, 1], strides = [1, 1]} : vector<8x6xf32> to vector<8x1xf32>
    %5 = vector.extract_strided_slice %1 {offsets = [0, 3], sizes = [8, 1], strides = [1, 1]} : vector<8x6xf32> to vector<8x1xf32>
    %c0_3 = arith.constant 0 : index
    %c0_4 = arith.constant 0 : index
    %6 = vector.load %arg0[%c0_3, %c0_4] : memref<4x256xf32, #tpu.memory_space<vmem>>, vector<4x256xf32>
    %c0_5 = arith.constant 0 : index
    %c0_6 = arith.constant 0 : index
    %7 = vector.load %arg1[%c0_5, %c0_6] : memref<8x36xf32, #tpu.memory_space<vmem>>, vector<8x36xf32>
    %c17_i32 = arith.constant 17 : i32
    %8 = tpu.dynamic_rotate %6 by %c17_i32 dim 1 : vector<4x256xf32>, i32 -> vector<4x256xf32>
    %9 = vector.extract_strided_slice %0 {offsets = [0, 0], sizes = [1, 256], strides = [1, 1]} : vector<9x256xf32> to vector<1x256xf32>
    %10 = vector.broadcast %9 : vector<1x256xf32> to vector<4x256xf32>
    %11 = arith.mulf %8, %10 : vector<4x256xf32>
    %c16_i32 = arith.constant 16 : i32
    %12 = tpu.dynamic_rotate %6 by %c16_i32 dim 1 : vector<4x256xf32>, i32 -> vector<4x256xf32>
    %13 = vector.extract_strided_slice %0 {offsets = [1, 0], sizes = [1, 256], strides = [1, 1]} : vector<9x256xf32> to vector<1x256xf32>
    %14 = vector.broadcast %13 : vector<1x256xf32> to vector<4x256xf32>
    %15 = arith.mulf %12, %14 : vector<4x256xf32>
    %c15_i32 = arith.constant 15 : i32
    %16 = tpu.dynamic_rotate %6 by %c15_i32 dim 1 : vector<4x256xf32>, i32 -> vector<4x256xf32>
    %17 = vector.extract_strided_slice %0 {offsets = [2, 0], sizes = [1, 256], strides = [1, 1]} : vector<9x256xf32> to vector<1x256xf32>
    %18 = vector.broadcast %17 : vector<1x256xf32> to vector<4x256xf32>
    %19 = arith.mulf %16, %18 : vector<4x256xf32>
    %c1_i32 = arith.constant 1 : i32
    %20 = tpu.dynamic_rotate %6 by %c1_i32 dim 1 : vector<4x256xf32>, i32 -> vector<4x256xf32>
    %21 = vector.extract_strided_slice %0 {offsets = [3, 0], sizes = [1, 256], strides = [1, 1]} : vector<9x256xf32> to vector<1x256xf32>
    %22 = vector.broadcast %21 : vector<1x256xf32> to vector<4x256xf32>
    %23 = arith.mulf %20, %22 : vector<4x256xf32>
    %24 = vector.extract_strided_slice %0 {offsets = [4, 0], sizes = [1, 256], strides = [1, 1]} : vector<9x256xf32> to vector<1x256xf32>
    %25 = vector.broadcast %24 : vector<1x256xf32> to vector<4x256xf32>
    %26 = arith.mulf %6, %25 : vector<4x256xf32>
    %c255_i32 = arith.constant 255 : i32
    %27 = tpu.dynamic_rotate %6 by %c255_i32 dim 1 : vector<4x256xf32>, i32 -> vector<4x256xf32>
    %28 = vector.extract_strided_slice %0 {offsets = [5, 0], sizes = [1, 256], strides = [1, 1]} : vector<9x256xf32> to vector<1x256xf32>
    %29 = vector.broadcast %28 : vector<1x256xf32> to vector<4x256xf32>
    %30 = arith.mulf %27, %29 : vector<4x256xf32>
    %c241_i32 = arith.constant 241 : i32
    %31 = tpu.dynamic_rotate %6 by %c241_i32 dim 1 : vector<4x256xf32>, i32 -> vector<4x256xf32>
    %32 = vector.extract_strided_slice %0 {offsets = [6, 0], sizes = [1, 256], strides = [1, 1]} : vector<9x256xf32> to vector<1x256xf32>
    %33 = vector.broadcast %32 : vector<1x256xf32> to vector<4x256xf32>
    %34 = arith.mulf %31, %33 : vector<4x256xf32>
    %c240_i32 = arith.constant 240 : i32
    %35 = tpu.dynamic_rotate %6 by %c240_i32 dim 1 : vector<4x256xf32>, i32 -> vector<4x256xf32>
    %36 = vector.extract_strided_slice %0 {offsets = [7, 0], sizes = [1, 256], strides = [1, 1]} : vector<9x256xf32> to vector<1x256xf32>
    %37 = vector.broadcast %36 : vector<1x256xf32> to vector<4x256xf32>
    %38 = arith.mulf %35, %37 : vector<4x256xf32>
    %c239_i32 = arith.constant 239 : i32
    %39 = tpu.dynamic_rotate %6 by %c239_i32 dim 1 : vector<4x256xf32>, i32 -> vector<4x256xf32>
    %40 = vector.extract_strided_slice %0 {offsets = [8, 0], sizes = [1, 256], strides = [1, 1]} : vector<9x256xf32> to vector<1x256xf32>
    %41 = vector.broadcast %40 : vector<1x256xf32> to vector<4x256xf32>
    %42 = arith.mulf %39, %41 : vector<4x256xf32>
    %43 = tpu.concatenate %11, %15, %19, %23, %26, %30, %34, %38, %42 in 0 : vector<4x256xf32>, vector<4x256xf32>, vector<4x256xf32>, vector<4x256xf32>, vector<4x256xf32>, vector<4x256xf32>, vector<4x256xf32>, vector<4x256xf32>, vector<4x256xf32> -> vector<36x256xf32>
    %cst = arith.constant dense<0.000000e+00> : vector<8x256xf32>
    %44 = tpu.matmul %7, %43, %cst {dimension_numbers = #tpu.dot_dimension_numbers<[1], [0], [0], [1], [0, 0, 1, 1], [], []>} : vector<8x36xf32>, vector<36x256xf32>, vector<8x256xf32> -> vector<8x256xf32>
    %45 = vector.broadcast %2 : vector<8x1xf32> to vector<8x256xf32>
    %46 = arith.addf %44, %45 : vector<8x256xf32>
    %cst_7 = arith.constant dense<0.000000e+00> : vector<8xf32>
    %47 = vector.multi_reduction <add>, %46, %cst_7 [1] : vector<8x256xf32> to vector<8xf32>
    %48 = vector.shape_cast %47 : vector<8xf32> to vector<8x1xf32>
    %49 = vector.shape_cast %4 : vector<8x1xf32> to vector<1x8x1xf32>
    %cst_8 = arith.constant dense<0.000000e+00> : vector<1xf32>
    %50 = vector.multi_reduction <add>, %49, %cst_8 [1, 2] : vector<1x8x1xf32> to vector<1xf32>
    %51 = vector.shape_cast %50 : vector<1xf32> to vector<1x1x1xf32>
    %52 = vector.extract %51[0, 0, 0] : f32 from vector<1x1x1xf32>
    %53 = arith.mulf %48, %4 : vector<8x1xf32>
    %54 = vector.shape_cast %53 : vector<8x1xf32> to vector<1x8x1xf32>
    %cst_9 = arith.constant dense<0.000000e+00> : vector<1xf32>
    %55 = vector.multi_reduction <add>, %54, %cst_9 [1, 2] : vector<1x8x1xf32> to vector<1xf32>
    %56 = vector.shape_cast %55 : vector<1xf32> to vector<1x1x1xf32>
    %57 = vector.extract %56[0, 0, 0] : f32 from vector<1x1x1xf32>
    %58 = arith.divf %57, %52 : f32
    %59 = vector.broadcast %58 : f32 to vector<8x1xf32>
    %60 = arith.subf %48, %59 : vector<8x1xf32>
    %61 = arith.mulf %60, %60 : vector<8x1xf32>
    %62 = arith.mulf %4, %61 : vector<8x1xf32>
    %63 = vector.shape_cast %62 : vector<8x1xf32> to vector<1x8x1xf32>
    %cst_10 = arith.constant dense<0.000000e+00> : vector<1xf32>
    %64 = vector.multi_reduction <add>, %63, %cst_10 [1, 2] : vector<1x8x1xf32> to vector<1xf32>
    %65 = vector.shape_cast %64 : vector<1xf32> to vector<1x1x1xf32>
    %66 = vector.extract %65[0, 0, 0] : f32 from vector<1x1x1xf32>
    %67 = arith.divf %66, %52 : f32
    %68 = math.sqrt %67 : f32
    %cst_11 = arith.constant 0.000000e+00 : f32
    %69 = vector.broadcast %cst_11 : f32 to vector<8x1xf32>
    %70 = arith.cmpf ogt, %4, %69 : vector<8x1xf32>
    %cst_12 = arith.constant 0x7F800000 : f32
    %71 = vector.broadcast %cst_12 : f32 to vector<8x1xf32>
    %72 = arith.select %70, %48, %71 : vector<8x1xi1>, vector<8x1xf32>
    %73 = vector.shape_cast %72 : vector<8x1xf32> to vector<1x8x1xf32>
    %cst_13 = arith.constant dense<0x7F800000> : vector<1xf32>
    %74 = vector.multi_reduction <minimumf>, %73, %cst_13 [1, 2] : vector<1x8x1xf32> to vector<1xf32>
    %75 = vector.shape_cast %74 : vector<1xf32> to vector<1x1x1xf32>
    %76 = vector.extract %75[0, 0, 0] : f32 from vector<1x1x1xf32>
    %cst_14 = arith.constant 0.000000e+00 : f32
    %77 = arith.cmpf one, %68, %cst_14 : f32
    %cst_15 = arith.constant 1.000000e+00 : f32
    %78 = arith.select %77, %68, %cst_15 : f32
    %cst_16 = arith.constant 1.000000e+00 : f32
    %79 = arith.divf %cst_16, %78 : f32
    %cst_17 = arith.constant 0.000000e+00 : f32
    %80 = arith.select %77, %79, %cst_17 : f32
    %81 = vector.broadcast %58 : f32 to vector<8x1xf32>
    %82 = arith.subf %48, %81 : vector<8x1xf32>
    %83 = vector.broadcast %80 : f32 to vector<8x1xf32>
    %84 = arith.mulf %82, %83 : vector<8x1xf32>
    %cst_18 = arith.constant 0.000000e+00 : f32
    %85 = vector.broadcast %cst_18 : f32 to vector<8x1xf32>
    %86 = arith.maximumf %85, %84 : vector<8x1xf32>
    %cst_19 = arith.constant 0.000000e+00 : f32
    %87 = vector.broadcast %cst_19 : f32 to vector<8x1xf32>
    %88 = arith.subf %87, %86 : vector<8x1xf32>
    %cst_20 = arith.constant 5.000000e-01 : f32
    %89 = vector.broadcast %cst_20 : f32 to vector<8x1xf32>
    %90 = arith.mulf %88, %89 : vector<8x1xf32>
    %91 = math.exp %90 : vector<8x1xf32>
    %92 = arith.mulf %91, %5 : vector<8x1xf32>
    %93 = vector.broadcast %76 : f32 to vector<8x1xf32>
    %94 = arith.subf %48, %93 : vector<8x1xf32>
    %95 = math.absf %94 : vector<8x1xf32>
    %96 = vector.broadcast %80 : f32 to vector<8x1xf32>
    %97 = arith.mulf %95, %96 : vector<8x1xf32>
    %cst_21 = arith.constant 0.000000e+00 : f32
    %98 = vector.broadcast %cst_21 : f32 to vector<8x1xf32>
    %99 = arith.subf %98, %97 : vector<8x1xf32>
    %cst_22 = arith.constant 0.333333343 : f32
    %100 = vector.broadcast %cst_22 : f32 to vector<8x1xf32>
    %101 = arith.mulf %99, %100 : vector<8x1xf32>
    %102 = math.exp %101 : vector<8x1xf32>
    %cst_23 = arith.constant 1.000000e+00 : f32
    %103 = vector.broadcast %cst_23 : f32 to vector<8x1xf32>
    %104 = arith.subf %103, %102 : vector<8x1xf32>
    %cst_24 = arith.constant 1.000000e+00 : f32
    %105 = vector.broadcast %cst_24 : f32 to vector<8x1xf32>
    %106 = vector.extract_strided_slice %1 {offsets = [0, 4], sizes = [8, 1], strides = [1, 1]} : vector<8x6xf32> to vector<8x1xf32>
    %107 = arith.mulf %104, %106 : vector<8x1xf32>
    %cst_25 = arith.constant 1.000000e+00 : f32
    %108 = vector.broadcast %cst_25 : f32 to vector<8x1xf32>
    %109 = arith.subf %108, %106 : vector<8x1xf32>
    %110 = arith.addf %107, %109 : vector<8x1xf32>
    %111 = arith.mulf %105, %110 : vector<8x1xf32>
    %112 = vector.extract_strided_slice %1 {offsets = [0, 5], sizes = [8, 1], strides = [1, 1]} : vector<8x6xf32> to vector<8x1xf32>
    %113 = arith.mulf %104, %112 : vector<8x1xf32>
    %cst_26 = arith.constant 1.000000e+00 : f32
    %114 = vector.broadcast %cst_26 : f32 to vector<8x1xf32>
    %115 = arith.subf %114, %112 : vector<8x1xf32>
    %116 = arith.addf %113, %115 : vector<8x1xf32>
    %117 = arith.mulf %111, %116 : vector<8x1xf32>
    %cst_27 = arith.constant 1.000000e+00 : f32
    %118 = vector.broadcast %cst_27 : f32 to vector<8x1xf32>
    %119 = arith.subf %118, %5 : vector<8x1xf32>
    %120 = arith.mulf %117, %119 : vector<8x1xf32>
    %121 = arith.addf %120, %92 : vector<8x1xf32>
    %122 = vector.broadcast %121 : vector<8x1xf32> to vector<8x256xf32>
    %123 = arith.mulf %46, %122 : vector<8x256xf32>
    %cst_28 = arith.constant 0.000000e+00 : f32
    %124 = vector.broadcast %cst_28 : f32 to vector<8x256xf32>
    %125 = arith.maximumf %123, %124 : vector<8x256xf32>
    %c0_29 = arith.constant 0 : index
    %c0_30 = arith.constant 0 : index
    %126 = vector.load %arg2[%c0_29, %c0_30] : memref<8x72xf32, #tpu.memory_space<vmem>>, vector<8x72xf32>
    %c17_i32_31 = arith.constant 17 : i32
    %127 = tpu.dynamic_rotate %125 by %c17_i32_31 dim 1 : vector<8x256xf32>, i32 -> vector<8x256xf32>
    %128 = vector.extract_strided_slice %0 {offsets = [0, 0], sizes = [1, 256], strides = [1, 1]} : vector<9x256xf32> to vector<1x256xf32>
    %129 = vector.broadcast %128 : vector<1x256xf32> to vector<8x256xf32>
    %130 = arith.mulf %127, %129 : vector<8x256xf32>
    %c16_i32_32 = arith.constant 16 : i32
    %131 = tpu.dynamic_rotate %125 by %c16_i32_32 dim 1 : vector<8x256xf32>, i32 -> vector<8x256xf32>
    %132 = vector.extract_strided_slice %0 {offsets = [1, 0], sizes = [1, 256], strides = [1, 1]} : vector<9x256xf32> to vector<1x256xf32>
    %133 = vector.broadcast %132 : vector<1x256xf32> to vector<8x256xf32>
    %134 = arith.mulf %131, %133 : vector<8x256xf32>
    %c15_i32_33 = arith.constant 15 : i32
    %135 = tpu.dynamic_rotate %125 by %c15_i32_33 dim 1 : vector<8x256xf32>, i32 -> vector<8x256xf32>
    %136 = vector.extract_strided_slice %0 {offsets = [2, 0], sizes = [1, 256], strides = [1, 1]} : vector<9x256xf32> to vector<1x256xf32>
    %137 = vector.broadcast %136 : vector<1x256xf32> to vector<8x256xf32>
    %138 = arith.mulf %135, %137 : vector<8x256xf32>
    %c1_i32_34 = arith.constant 1 : i32
    %139 = tpu.dynamic_rotate %125 by %c1_i32_34 dim 1 : vector<8x256xf32>, i32 -> vector<8x256xf32>
    %140 = vector.extract_strided_slice %0 {offsets = [3, 0], sizes = [1, 256], strides = [1, 1]} : vector<9x256xf32> to vector<1x256xf32>
    %141 = vector.broadcast %140 : vector<1x256xf32> to vector<8x256xf32>
    %142 = arith.mulf %139, %141 : vector<8x256xf32>
    %143 = vector.extract_strided_slice %0 {offsets = [4, 0], sizes = [1, 256], strides = [1, 1]} : vector<9x256xf32> to vector<1x256xf32>
    %144 = vector.broadcast %143 : vector<1x256xf32> to vector<8x256xf32>
    %145 = arith.mulf %125, %144 : vector<8x256xf32>
    %c255_i32_35 = arith.constant 255 : i32
    %146 = tpu.dynamic_rotate %125 by %c255_i32_35 dim 1 : vector<8x256xf32>, i32 -> vector<8x256xf32>
    %147 = vector.extract_strided_slice %0 {offsets = [5, 0], sizes = [1, 256], strides = [1, 1]} : vector<9x256xf32> to vector<1x256xf32>
    %148 = vector.broadcast %147 : vector<1x256xf32> to vector<8x256xf32>
    %149 = arith.mulf %146, %148 : vector<8x256xf32>
    %c241_i32_36 = arith.constant 241 : i32
    %150 = tpu.dynamic_rotate %125 by %c241_i32_36 dim 1 : vector<8x256xf32>, i32 -> vector<8x256xf32>
    %151 = vector.extract_strided_slice %0 {offsets = [6, 0], sizes = [1, 256], strides = [1, 1]} : vector<9x256xf32> to vector<1x256xf32>
    %152 = vector.broadcast %151 : vector<1x256xf32> to vector<8x256xf32>
    %153 = arith.mulf %150, %152 : vector<8x256xf32>
    %c240_i32_37 = arith.constant 240 : i32
    %154 = tpu.dynamic_rotate %125 by %c240_i32_37 dim 1 : vector<8x256xf32>, i32 -> vector<8x256xf32>
    %155 = vector.extract_strided_slice %0 {offsets = [7, 0], sizes = [1, 256], strides = [1, 1]} : vector<9x256xf32> to vector<1x256xf32>
    %156 = vector.broadcast %155 : vector<1x256xf32> to vector<8x256xf32>
    %157 = arith.mulf %154, %156 : vector<8x256xf32>
    %c239_i32_38 = arith.constant 239 : i32
    %158 = tpu.dynamic_rotate %125 by %c239_i32_38 dim 1 : vector<8x256xf32>, i32 -> vector<8x256xf32>
    %159 = vector.extract_strided_slice %0 {offsets = [8, 0], sizes = [1, 256], strides = [1, 1]} : vector<9x256xf32> to vector<1x256xf32>
    %160 = vector.broadcast %159 : vector<1x256xf32> to vector<8x256xf32>
    %161 = arith.mulf %158, %160 : vector<8x256xf32>
    %162 = tpu.concatenate %130, %134, %138, %142, %145, %149, %153, %157, %161 in 0 : vector<8x256xf32>, vector<8x256xf32>, vector<8x256xf32>, vector<8x256xf32>, vector<8x256xf32>, vector<8x256xf32>, vector<8x256xf32>, vector<8x256xf32>, vector<8x256xf32> -> vector<72x256xf32>
    %cst_39 = arith.constant dense<0.000000e+00> : vector<8x256xf32>
    %163 = tpu.matmul %126, %162, %cst_39 {dimension_numbers = #tpu.dot_dimension_numbers<[1], [0], [0], [1], [0, 0, 1, 1], [], []>} : vector<8x72xf32>, vector<72x256xf32>, vector<8x256xf32> -> vector<8x256xf32>
    %164 = vector.broadcast %3 : vector<8x1xf32> to vector<8x256xf32>
    %165 = arith.addf %163, %164 : vector<8x256xf32>
    %cst_40 = arith.constant dense<0.000000e+00> : vector<8xf32>
    %166 = vector.multi_reduction <add>, %165, %cst_40 [1] : vector<8x256xf32> to vector<8xf32>
    %167 = vector.shape_cast %166 : vector<8xf32> to vector<8x1xf32>
    %168 = vector.shape_cast %4 : vector<8x1xf32> to vector<1x8x1xf32>
    %cst_41 = arith.constant dense<0.000000e+00> : vector<1xf32>
    %169 = vector.multi_reduction <add>, %168, %cst_41 [1, 2] : vector<1x8x1xf32> to vector<1xf32>
    %170 = vector.shape_cast %169 : vector<1xf32> to vector<1x1x1xf32>
    %171 = vector.extract %170[0, 0, 0] : f32 from vector<1x1x1xf32>
    %172 = arith.mulf %167, %4 : vector<8x1xf32>
    %173 = vector.shape_cast %172 : vector<8x1xf32> to vector<1x8x1xf32>
    %cst_42 = arith.constant dense<0.000000e+00> : vector<1xf32>
    %174 = vector.multi_reduction <add>, %173, %cst_42 [1, 2] : vector<1x8x1xf32> to vector<1xf32>
    %175 = vector.shape_cast %174 : vector<1xf32> to vector<1x1x1xf32>
    %176 = vector.extract %175[0, 0, 0] : f32 from vector<1x1x1xf32>
    %177 = arith.divf %176, %171 : f32
    %178 = vector.broadcast %177 : f32 to vector<8x1xf32>
    %179 = arith.subf %167, %178 : vector<8x1xf32>
    %180 = arith.mulf %179, %179 : vector<8x1xf32>
    %181 = arith.mulf %4, %180 : vector<8x1xf32>
    %182 = vector.shape_cast %181 : vector<8x1xf32> to vector<1x8x1xf32>
    %cst_43 = arith.constant dense<0.000000e+00> : vector<1xf32>
    %183 = vector.multi_reduction <add>, %182, %cst_43 [1, 2] : vector<1x8x1xf32> to vector<1xf32>
    %184 = vector.shape_cast %183 : vector<1xf32> to vector<1x1x1xf32>
    %185 = vector.extract %184[0, 0, 0] : f32 from vector<1x1x1xf32>
    %186 = arith.divf %185, %171 : f32
    %187 = math.sqrt %186 : f32
    %cst_44 = arith.constant 0.000000e+00 : f32
    %188 = vector.broadcast %cst_44 : f32 to vector<8x1xf32>
    %189 = arith.cmpf ogt, %4, %188 : vector<8x1xf32>
    %cst_45 = arith.constant 0x7F800000 : f32
    %190 = vector.broadcast %cst_45 : f32 to vector<8x1xf32>
    %191 = arith.select %189, %167, %190 : vector<8x1xi1>, vector<8x1xf32>
    %192 = vector.shape_cast %191 : vector<8x1xf32> to vector<1x8x1xf32>
    %cst_46 = arith.constant dense<0x7F800000> : vector<1xf32>
    %193 = vector.multi_reduction <minimumf>, %192, %cst_46 [1, 2] : vector<1x8x1xf32> to vector<1xf32>
    %194 = vector.shape_cast %193 : vector<1xf32> to vector<1x1x1xf32>
    %195 = vector.extract %194[0, 0, 0] : f32 from vector<1x1x1xf32>
    %cst_47 = arith.constant 0.000000e+00 : f32
    %196 = arith.cmpf one, %187, %cst_47 : f32
    %cst_48 = arith.constant 1.000000e+00 : f32
    %197 = arith.select %196, %187, %cst_48 : f32
    %cst_49 = arith.constant 1.000000e+00 : f32
    %198 = arith.divf %cst_49, %197 : f32
    %cst_50 = arith.constant 0.000000e+00 : f32
    %199 = arith.select %196, %198, %cst_50 : f32
    %200 = vector.broadcast %177 : f32 to vector<8x1xf32>
    %201 = arith.subf %167, %200 : vector<8x1xf32>
    %202 = vector.broadcast %199 : f32 to vector<8x1xf32>
    %203 = arith.mulf %201, %202 : vector<8x1xf32>
    %cst_51 = arith.constant 0.000000e+00 : f32
    %204 = vector.broadcast %cst_51 : f32 to vector<8x1xf32>
    %205 = arith.maximumf %204, %203 : vector<8x1xf32>
    %cst_52 = arith.constant 0.000000e+00 : f32
    %206 = vector.broadcast %cst_52 : f32 to vector<8x1xf32>
    %207 = arith.subf %206, %205 : vector<8x1xf32>
    %cst_53 = arith.constant 5.000000e-01 : f32
    %208 = vector.broadcast %cst_53 : f32 to vector<8x1xf32>
    %209 = arith.mulf %207, %208 : vector<8x1xf32>
    %210 = math.exp %209 : vector<8x1xf32>
    %211 = arith.mulf %210, %5 : vector<8x1xf32>
    %212 = vector.broadcast %195 : f32 to vector<8x1xf32>
    %213 = arith.subf %167, %212 : vector<8x1xf32>
    %214 = math.absf %213 : vector<8x1xf32>
    %215 = vector.broadcast %199 : f32 to vector<8x1xf32>
    %216 = arith.mulf %214, %215 : vector<8x1xf32>
    %cst_54 = arith.constant 0.000000e+00 : f32
    %217 = vector.broadcast %cst_54 : f32 to vector<8x1xf32>
    %218 = arith.subf %217, %216 : vector<8x1xf32>
    %cst_55 = arith.constant 0.333333343 : f32
    %219 = vector.broadcast %cst_55 : f32 to vector<8x1xf32>
    %220 = arith.mulf %218, %219 : vector<8x1xf32>
    %221 = math.exp %220 : vector<8x1xf32>
    %cst_56 = arith.constant 1.000000e+00 : f32
    %222 = vector.broadcast %cst_56 : f32 to vector<8x1xf32>
    %223 = arith.subf %222, %221 : vector<8x1xf32>
    %cst_57 = arith.constant 1.000000e+00 : f32
    %224 = vector.broadcast %cst_57 : f32 to vector<8x1xf32>
    %225 = vector.extract_strided_slice %1 {offsets = [0, 4], sizes = [8, 1], strides = [1, 1]} : vector<8x6xf32> to vector<8x1xf32>
    %226 = arith.mulf %223, %225 : vector<8x1xf32>
    %cst_58 = arith.constant 1.000000e+00 : f32
    %227 = vector.broadcast %cst_58 : f32 to vector<8x1xf32>
    %228 = arith.subf %227, %225 : vector<8x1xf32>
    %229 = arith.addf %226, %228 : vector<8x1xf32>
    %230 = arith.mulf %224, %229 : vector<8x1xf32>
    %231 = vector.extract_strided_slice %1 {offsets = [0, 5], sizes = [8, 1], strides = [1, 1]} : vector<8x6xf32> to vector<8x1xf32>
    %232 = arith.mulf %223, %231 : vector<8x1xf32>
    %cst_59 = arith.constant 1.000000e+00 : f32
    %233 = vector.broadcast %cst_59 : f32 to vector<8x1xf32>
    %234 = arith.subf %233, %231 : vector<8x1xf32>
    %235 = arith.addf %232, %234 : vector<8x1xf32>
    %236 = arith.mulf %230, %235 : vector<8x1xf32>
    %cst_60 = arith.constant 1.000000e+00 : f32
    %237 = vector.broadcast %cst_60 : f32 to vector<8x1xf32>
    %238 = arith.subf %237, %5 : vector<8x1xf32>
    %239 = arith.mulf %236, %238 : vector<8x1xf32>
    %240 = arith.addf %239, %211 : vector<8x1xf32>
    %241 = vector.broadcast %240 : vector<8x1xf32> to vector<8x256xf32>
    %242 = arith.mulf %165, %241 : vector<8x256xf32>
    %c0_61 = arith.constant 0 : index
    %c0_62 = arith.constant 0 : index
    %243 = vector.load %arg5[%c0_61, %c0_62] : memref<8x256xf32, #tpu.memory_space<vmem>>, vector<8x256xf32>
    tpu.vector_store %arg5[%c0_61, %c0_62], %242 {strides = array<i32>} : memref<8x256xf32, #tpu.memory_space<vmem>>, vector<8x256xf32>,
    return
  }
}

</mosaic_0001>

<bundles_post_ra>
// kernel: tpu_custom_call.1
= control target key start
LH: loop header
LB: loop body
LE: loop exit
PB: predicated region body
PF: predicated region fallthrough
CT: control target
= control target key end

     0   :  { %10 = vsyncpa [#allocation3], 0  ;;  %s1399_s0 = inlined_call_operand.hbm [shape: f32[4,256], index: 0, kind: input, shape index: {}]   ;;  %s1400_s1 = inlined_call_operand.hbm [shape: f32[8,36], index: 1, kind: input, shape index: {}]   ;;  %s1401_s2 = inlined_call_operand.hbm [shape: f32[8,72], index: 2, kind: input, shape index: {}]   ;;  %s1402_s3 = inlined_call_operand.hbm [shape: f32[9,256], index: 3, kind: input, shape index: {}]   ;;  %s1403_s4 = inlined_call_operand.vmem [shape: f32[8,6], index: 4, kind: input, shape index: {}]   ;;  %s1404_s5 = inlined_call_operand.hbm [shape: f32[8,256], index: 5, kind: output, shape index: {}]  }
   0x1   :  { %11 = vsyncpa [#allocation6], 0 }
   0x2   :  { %12 = vsyncpa [#allocation9], 0 }
   0x3   :  { %13 = vsyncpa [#allocation4], 0  ;;  %s969_s18 = smov [#allocation5]   ;;  %s970_s20 = smov [#allocation2]  }
   0x4   :  { %s30_s19 = sshll.u32 %s969_s18, 4  ;;  %s20_s21 = sshll.u32 %s970_s20, 4  ;;  %s31_s19 = int_to_ptr.vmem [resolvable:$true] %s30_s19  ;;  %s21_s21 = int_to_ptr.vmem [resolvable:$true] %s20_s21 }
   0x5   :  { %s851_s24 = scalar_lea.hbm %s1400_s1, 128 }
   0x6   :  { %p852_p0 = scmp.ne.s32.totalorder %s1400_s1, %s851_s24  ;;  %p855_p1 = scmp.lt.u32.totalorder %s851_s24, %s1400_s1 }
   0x8   :  { %p857_p2 = pnand %p855_p1, %p852_p0 }
   0xa   :  { %860 = shalt.err (!%p857_p2)
}
   0xb   :  { %s861_s29 = scalar_lea.vmem %s31_s19, 128  ;;  %p866_p4 = scmp.lt.s32.totalorder %s31_s19, %s31_s19 }
   0xc   :  { %p862_p3 = scmp.ne.s32.totalorder %s31_s19, %s861_s29  ;;  %p867_p5 = scmp.lt.s32.totalorder %s861_s29, %s861_s29 }
   0xe   :  { %p868_p6 = por %p867_p5, %p866_p4 }
  0x10   :  { %p869_p7 = pnand %p868_p6, %p862_p3 }
  0x12   :  { %872 = shalt.err (!%p869_p7)
}
  0x13   :  { %33 = dma.hbm_to_vmem [thread:$0]  %s1400_s1, 128, %s31_s19, [#allocation6]  }
  0x14   :  { %s873_s9 = scalar_lea.hbm %s1399_s0, 128 }
  0x15   :  { %p874_p8 = scmp.ne.s32.totalorder %s1399_s0, %s873_s9  ;;  %p877_p9 = scmp.lt.u32.totalorder %s873_s9, %s1399_s0 }
  0x17   :  { %p879_p10 = pnand %p877_p9, %p874_p8 }
  0x19   :  { %882 = shalt.err (!%p879_p10)
}
  0x1a   :  { %s883_s14 = scalar_lea.vmem %s21_s21, 128  ;;  %p888_p12 = scmp.lt.s32.totalorder %s21_s21, %s21_s21 }
  0x1b   :  { %p884_p11 = scmp.ne.s32.totalorder %s21_s21, %s883_s14  ;;  %p889_p13 = scmp.lt.s32.totalorder %s883_s14, %s883_s14 }
  0x1d   :  { %p890_p0 = por %p889_p13, %p888_p12 }
  0x1f   :  { %p891_p1 = pnand %p890_p0, %p884_p11 }
  0x21   :  { %894 = shalt.err (!%p891_p1)
}
  0x22   :  { %23 = dma.hbm_to_vmem [thread:$0]  %s1399_s0, 128, %s21_s21, [#allocation3]  }
  0x23   :  { %s971_s16 = smov [#allocation7]   ;;  %s972_s18 = smov [#allocation8]  }
  0x24   :  { %s40_s17 = sshll.u32 %s971_s16, 4  ;;  %s49_s19 = sshll.u32 %s972_s18, 4  ;;  %s41_s17 = int_to_ptr.vmem [resolvable:$true] %s40_s17  ;;  %s1042_s19 = int_to_ptr.vmem [resolvable:$true] %s49_s19 }
  0x25   :  { %s895_s23 = scalar_lea.hbm %s1401_s2, 128 }
  0x26   :  { %p896_p2 = scmp.ne.s32.totalorder %s1401_s2, %s895_s23  ;;  %p899_p3 = scmp.lt.u32.totalorder %s895_s23, %s1401_s2 }
  0x28   :  { %p901_p4 = pnand %p899_p3, %p896_p2 }
  0x2a   :  { %904 = shalt.err (!%p901_p4)
}
  0x2b   :  { %s905_s0 = scalar_lea.vmem %s41_s17, 128  ;;  %p910_p6 = scmp.lt.s32.totalorder %s41_s17, %s41_s17 }
  0x2c   :  { %p906_p5 = scmp.ne.s32.totalorder %s41_s17, %s905_s0  ;;  %p911_p7 = scmp.lt.s32.totalorder %s905_s0, %s905_s0 }
  0x2e   :  { %p912_p8 = por %p911_p7, %p910_p6 }
  0x30   :  { %p913_p9 = pnand %p912_p8, %p906_p5 }
  0x32   :  { %916 = shalt.err (!%p913_p9)
}
  0x33   :  { %43 = dma.hbm_to_vmem [thread:$0]  %s1401_s2, 128, %s41_s17, [#allocation6]  }
  0x34   :  { %s917_s6 = scalar_lea.hbm %s1402_s3, 512 }
  0x35   :  { %p918_p10 = scmp.ne.s32.totalorder %s1402_s3, %s917_s6  ;;  %p921_p11 = scmp.lt.u32.totalorder %s917_s6, %s1402_s3 }
  0x37   :  { %p923_p12 = pnand %p921_p11, %p918_p10 }
  0x39   :  { %926 = shalt.err (!%p923_p12)
}
  0x3a   :  { %s927_s11 = scalar_lea.vmem %s1042_s19, 512  ;;  %p932_p0 = scmp.lt.s32.totalorder %s1042_s19, %s1042_s19 }
  0x3b   :  { %p928_p13 = scmp.ne.s32.totalorder %s1042_s19, %s927_s11  ;;  %p933_p1 = scmp.lt.s32.totalorder %s927_s11, %s927_s11 }
  0x3d   :  { %p934_p2 = por %p933_p1, %p932_p0 }
  0x3f   :  { %p935_p3 = pnand %p934_p2, %p928_p13 }
  0x41   :  { %938 = shalt.err (!%p935_p3)
}
  0x42   :  { %s973_s2 = smov 256   ;;  %s974_s12 = smov 16  }
  0x43   :  { %55 = dma.hbm_to_vmem [thread:$0]  %s1402_s3, 512, %s1042_s19, [#allocation9], %s973_s2, %s973_s2, %s974_s12  }
  0x44   :  { %961 = dma.done.wait [#allocation3], 128  }
  0x45   :  { %962 = vsyncadd [#allocation3], 4294967168 }
  0x46   :  { %963 = dma.done.wait [#allocation6], 256  }
  0x47   :  { %964 = vsyncadd [#allocation6], 4294967040 }
  0x48   :  { %965 = dma.done.wait [#allocation9], 512  }
  0x49   :  { %966 = vsyncadd [#allocation9], 4294966784  ;;  %v1074_v0 = vld [vmem:[#allocation2] sm:$0xff]  ;;  %s975_s1 = smov 1   ;;  %s976_s15 = smov 17   ;;  %v980_v2 = vmov 0.0   ;;  %v84_v5 = vlaneseq }
  0x4a   :  { %133 = vrot.lane.b32.xlu1 %v1074_v0, %s975_s1  ;;  %99 = vrot.lane.b32.xlu0 %v1074_v0, %s974_s12  ;;  %v78_v1 = vcombine.high %v1074_v0, %v1074_v0  ;;  %s977_s3 = smov 15   ;;  %s978_s16 = smov 127   ;;  %v982_v3 = vmov 0   ;;  %v1105_v4 = vld [vmem:[%s1403_s4] sm:$0xff]  ;;  %v1113_v11 = vld [vmem:[#allocation8] sm:$0xff]  ;;  %vm258_vm4 = vcmask 1043456  }
  0x4b   :  { %s979_s17 = smov 112   ;;  %346 = vmatprep.mubr.f32.mxu0 %v980_v2  ;;  %622 = vmatprep.mubr.f32.mxu1 %v980_v2  ;;  %s981_s18 = smov 113   ;;  %v1108_v6 = vshrl.u32 %v84_v5, 7  ;;  %v1110_v7 = vand.u32 127, %v84_v5  ;;  %v1115_v12 = vld [vmem:[#allocation8 + $0x8] sm:$0xff]  ;;  %vm272_vm9 = vcmask 293888  }
  0x4c   :  { %828 = vset.pattern.permute.xlu0 %v982_v3  ;;  %s983_s19 = smov 111   ;;  %s984_s4 = smov 126   ;;  %vm359_vm10 = vcmask 7168   ;;  %vm420_vm11 = vcmp.gt.f32.partialorder %v1105_v4, 0.0  ;;  %vm422_vm12 = vcmask 23568   ;;  %vm554_vm15 = vcmask 588800  }
  0x4d   :  { %v142_v10 = vsub.s32 3, %v1108_v6  ;;  %v108_v13 = vsub.s32 1, %v1108_v6  ;;  %vm137_vm0 = vcmp.lt.s32.totalorder %v1110_v7, 1  ;;  %v91_v16 = vsub.s32 0, %v1108_v6  ;;  %s987_s2 = smov [#allocation10]  }
  0x4e   :  { %80 = vrot.lane.b32.xlu0 %v1074_v0, %s976_s15  ;;  %135 = vrot.lane.b32.xlu1 %v78_v1, %s975_s1  ;;  %vm103_vm1 = vcmp.lt.s32.totalorder %v1110_v7, 16  ;;  %v125_v19 = vsub.s32 2, %v1108_v6  ;;  %vm86_vm2 = vcmp.lt.s32.totalorder %v1110_v7, 17  ;;  %vm120_vm3 = vcmp.lt.s32.totalorder %v1110_v7, 15 }
  0x4f   :  { %v1121_v17 = vrot.slane %v1113_v11, %v142_v10  ;;  %v1124_v18 = vrot.slane %v1115_v12, %v142_v10  ;;  %v1133_v22 = vrot.slane %v1113_v11, %v108_v13  ;;  %v1136_v23 = vrot.slane %v1115_v12, %v108_v13 }
  0x50   :  { %v152_v24 = vsub.s32 4, %v1108_v6  ;;  %v1142_v26 = vrot.slane %v1113_v11, %v91_v16  ;;  %v1145_v27 = vrot.slane %v1115_v12, %v91_v16  ;;  %v172_v29 = vsub.s32 5, %v1108_v6 }
  0x51   :  { %v1157_v36 = vrot.slane %v1113_v11, %v125_v19  ;;  %v1160_v37 = vrot.slane %v1115_v12, %v125_v19  ;;  %vm167_vm5 = vcmp.lt.s32.totalorder %v1110_v7, 127  ;;  %v206_v46 = vsub.s32 7, %v1108_v6 }
  0x52   :  { %82 = vrot.lane.b32.xlu1 %v78_v1, %s976_s15  ;;  %101 = vrot.lane.b32.xlu0 %v78_v1, %s974_s12  ;;  %v1167_v40 = vrot.slane %v1113_v11, %v152_v24  ;;  %v1170_v41 = vrot.slane %v1115_v12, %v152_v24  ;;  %v1183_v55 = vrot.slane %v1113_v11, %v172_v29  ;;  %vm201_vm6 = vcmp.lt.s32.totalorder %v1110_v7, 112 }
  0x53   :  { %v1186_v56 = vrot.slane %v1115_v12, %v172_v29  ;;  %v189_v10 = vsub.s32 6, %v1108_v6  ;;  %vm184_vm7 = vcmp.lt.s32.totalorder %v1110_v7, 113  ;;  %vm218_vm8 = vcmp.lt.s32.totalorder %v1110_v7, 111 }
  0x54   :  { %v160_v57 = vcombine.low %v1167_v40, %v1170_v41 }
  0x56   :  { %118 = vrot.lane.b32.xlu1 %v78_v1, %s977_s3  ;;  %116 = vrot.lane.b32.xlu0 %v1074_v0, %s977_s3  ;;  %v162_v19 = vmul.f32 %v160_v57, %v1074_v0  ;;  %v76_v57 = vld [vmem:[#allocation5] sm:$0xff] }
  0x5a   :  { %165 = vrot.lane.b32.xlu1 %v78_v1, %s978_s16  ;;  %163 = vrot.lane.b32.xlu0 %v1074_v0, %s978_s16 }
  0x5e   :  { %199 = vrot.lane.b32.xlu1 %v78_v1, %s979_s17  ;;  %197 = vrot.lane.b32.xlu0 %v1074_v0, %s979_s17 }
  0x62   :  { %182 = vrot.lane.b32.xlu1 %v78_v1, %s981_s18  ;;  %180 = vrot.lane.b32.xlu0 %v1074_v0, %s981_s18 }
  0x66   :  { %216 = vrot.lane.b32.xlu1 %v78_v1, %s983_s19  ;;  %214 = vrot.lane.b32.xlu0 %v1074_v0, %s983_s19 }
  0x6a   :  { %269 = vperm.xlu0 %828, %v1105_v4  }
  0x6e   :  { %356 = vrot.lane.b32.xlu0 %v1105_v4, %s984_s4 }
  0xbc   :  { %v134_v8 = vpop.permute.xlu1 %133  ;;  %v100_v9 = vpop.permute.xlu0 %99 }
  0xc0   :  { %v81_v14 = vpop.permute.xlu0 %80  ;;  %v136_v15 = vpop.permute.xlu1 %135 }
  0xc1   :  { %v138_v20 = vsel %vm137_vm0, %v134_v8, %v136_v15  ;;  %v139_v21 = vsel %vm137_vm0, %v136_v15, %v134_v8  ;;  %v1200_v8 = vrot.slane %v1113_v11, %v206_v46 }
  0xc2   :  { %v148_v30 = vmul.f32 %v1121_v17, %v139_v21  ;;  %v149_v31 = vmul.f32 %v1124_v18, %v138_v20 }
  0xc4   :  { %v83_v25 = vpop.permute.xlu1 %82  ;;  %v102_v28 = vpop.permute.xlu0 %101  ;;  %v239_v47 = vrot.slane %v148_v30, 4  ;;  %v240_v48 = vrot.slane %v149_v31, 4 }
  0xc5   :  { %v104_v32 = vsel %vm103_vm1, %v100_v9, %v102_v28  ;;  %v105_v33 = vsel %vm103_vm1, %v102_v28, %v100_v9  ;;  %v87_v38 = vsel %vm86_vm2, %v81_v14, %v83_v25  ;;  %v88_v39 = vsel %vm86_vm2, %v83_v25, %v81_v14 }
  0xc6   :  { %v114_v34 = vmul.f32 %v1133_v22, %v105_v33  ;;  %v115_v35 = vmul.f32 %v1136_v23, %v104_v32  ;;  %v97_v51 = vmul.f32 %v1142_v26, %v88_v39  ;;  %v98_v52 = vmul.f32 %v1145_v27, %v87_v38  ;;  %v1229_v39 = vld [vmem:[#allocation8 + $0x18] ss:$0 sm:$0xff] }
  0xc7   :  { %v1203_v9 = vrot.slane %v1115_v12, %v206_v46  ;;  %v1217_v25 = vrot.slane %v1113_v11, %v189_v10  ;;  %v1220_v28 = vrot.slane %v1115_v12, %v189_v10  ;;  %v244_v32 = vcombine.high %v162_v19, %v162_v19 }
  0xc8   :  { %v233_v42 = vrot.slane %v114_v34, 4  ;;  %v234_v43 = vrot.slane %v115_v35, 4  ;;  %v119_v44 = vpop.permute.xlu1 %118  ;;  %v117_v45 = vpop.permute.xlu0 %116 }
  0xc9   :  { %v121_v49 = vsel %vm120_vm3, %v117_v45, %v119_v44  ;;  %v122_v50 = vsel %vm120_vm3, %v119_v44, %v117_v45 }
  0xca   :  { %v131_v53 = vmul.f32 %v1157_v36, %v122_v50  ;;  %v132_v54 = vmul.f32 %v1160_v37, %v121_v49  ;;  %v260_v60 = vsel %vm258_vm4, %v98_v52, %v234_v43  ;;  %v259_v62 = vsel %vm258_vm4, %v97_v51, %v233_v42 }
  0xcc   :  { %v166_v58 = vpop.permute.xlu1 %165  ;;  %v164_v59 = vpop.permute.xlu0 %163  ;;  %v262_v61 = vsel %vm258_vm4, %v132_v54, %v240_v48  ;;  %v261_v63 = vsel %vm258_vm4, %v131_v53, %v239_v47  ;;  %v1235_v48 = vld [vmem:[#allocation8 + $0x10] ss:$0 sm:$0xff] }
  0xcd   :  { %v168_v1 = vsel %vm167_vm5, %v164_v59, %v166_v58  ;;  %v169_v2 = vsel %vm167_vm5, %v166_v58, %v164_v59  ;;  %v761_v3 = vpack.c.bf16 %v262_v61, %v260_v60  ;;  %v763_v5 = vpack.c.bf16 %v261_v63, %v259_v62 }
  0xce   :  { %v178_v13 = vmul.f32 %v1183_v55, %v168_v1  ;;  %v179_v14 = vmul.f32 %v1186_v56, %v169_v2 }
  0xcf   :  { %762 = vmatprep.subr.bf16.mxu0 %v761_v3 }
  0xd0   :  { %v200_v15 = vpop.permute.xlu1 %199  ;;  %v198_v16 = vpop.permute.xlu0 %197  ;;  %764 = vmatpush1.bf16.msra.mxu0 %v763_v5  ;;  %v248_v29 = vrot.slane %v178_v13, 4  ;;  %v249_v0 = vrot.slane %v179_v14, 4 }
  0xd1   :  { %v202_v20 = vsel %vm201_vm6, %v198_v16, %v200_v15  ;;  %v203_v21 = vsel %vm201_vm6, %v200_v15, %v198_v16 }
  0xd2   :  { %v212_v6 = vmul.f32 %v1200_v8, %v202_v20  ;;  %v213_v24 = vmul.f32 %v1203_v9, %v203_v21  ;;  %v264_v44 = vsel %vm258_vm4, %v244_v32, %v249_v0  ;;  %v263_v46 = vsel %vm258_vm4, %v162_v19, %v248_v29 }
  0xd4   :  { %v183_v30 = vpop.permute.xlu1 %182  ;;  %v181_v31 = vpop.permute.xlu0 %180  ;;  %v254_v35 = vrot.slane %v212_v6, 4  ;;  %v255_v38 = vrot.slane %v213_v24, 4 }
  0xd5   :  { %v185_v33 = vsel %vm184_vm7, %v181_v31, %v183_v30  ;;  %v186_v34 = vsel %vm184_vm7, %v183_v30, %v181_v31 }
  0xd6   :  { %v195_v11 = vmul.f32 %v1217_v25, %v185_v33  ;;  %v196_v12 = vmul.f32 %v1220_v28, %v186_v34 }
  0xd8   :  { %v217_v42 = vpop.permute.xlu1 %216  ;;  %v215_v43 = vpop.permute.xlu0 %214  ;;  %v266_v45 = vsel %vm258_vm4, %v196_v12, %v255_v38  ;;  %v265_v47 = vsel %vm258_vm4, %v195_v11, %v254_v35 }
  0xd9   :  { %v219_v49 = vsel %vm218_vm8, %v215_v43, %v217_v42  ;;  %v220_v50 = vsel %vm218_vm8, %v217_v42, %v215_v43  ;;  %v765_v51 = vpack.c.bf16 %v266_v45, %v264_v44  ;;  %v767_v52 = vpack.c.bf16 %v265_v47, %v263_v46 }
  0xda   :  { %v230_v53 = vmul.f32 %v1229_v39, %v220_v50  ;;  %v229_v54 = vmul.f32 %v1235_v48, %v219_v49 }
  0xdb   :  { %766 = vmatprep.subr.bf16.mxu0 %v765_v51 }
  0xdc   :  { %768 = vmatpush1.bf16.msra.mxu0 %v767_v52 }
  0xdd   :  { %757 = vmatprep.subr.msk.mxu0 %vm258_vm4, %v230_v53 }
  0xe0   :  { %758 = vmatpush1.msk.msra.mxu0 %vm258_vm4, %v229_v54 }
  0xe1   :  { %759 = vmatmul.mubr.msk.f32.vlgmr.msra.gmra.mrb[0].mxu0 %vm272_vm9, %v76_v57 }
  0xe9   :  { %v270_v58 = vpop.permute.xlu0 %269 }
  0xed   :  { %v357_v1 = vpop.permute.xlu0 %356 }
  0xee   :  { %v360_v2 = vsel %vm359_vm10, %v357_v1, 0.0 }
  0xef   :  { %361 = vadd.xlane.f32.xlu0 %v360_v2 }
 0x17c   :  { %v362_v10 = vpop.xlane.xlu0 %361 }
 0x17d   :  { %v363_v13 = vrot.slane %v362_v10, 4 }
 0x17f   :  { %v364_v14 = vadd.f32 %v363_v13, %v362_v10 }
 0x181   :  { %v365_v15 = vrot.slane %v364_v14, 2 }
 0x183   :  { %v366_v16 = vadd.f32 %v365_v15, %v364_v14 }
 0x185   :  { %v367_v19 = vrot.slane %v366_v16, 1 }
 0x187   :  { %v368_v20 = vadd.f32 %v367_v19, %v366_v16  ;;  %v1274_v19 = vsub.f32 1.0, %v1105_v4 }
 0x189   :  { %785 = vpush %v368_v20 }
 0x1b4   :  { %v348_v59 = vpop.f32.mrb[0].mxu0 }
 0x1b5   :  { %v1247_v60 = vadd.f32 %v348_v59, %v270_v58  ;;  %v350_v61 = vpop.f32.mrb[1].mxu0 }
 0x1b6   :  { %v1249_v62 = vadd.f32 %v350_v61, %v270_v58 }
 0x1b8   :  { %v353_v63 = vadd.f32 %v1249_v62, %v1247_v60 }
 0x1ba   :  { %354 = vadd.xlane.f32.xlu1 %v353_v63  ;;  %s786_s23 = spop %785 }
 0x1bb   :  { %v385_v24 = vstv %s786_s23 }
 0x1bc   :  { %833 = vrcp.f32 %v385_v24 }
 0x1c6   :  { %v834_v35 = vpop.eup %833 }
 0x247   :  { %v1254_v3 = vpop.xlane.xlu1 %354 }
 0x248   :  { %v370_v5 = vmul.f32 %v1254_v3, %v1105_v4  ;;  %v421_v43 = vsel %vm420_vm11, %v1254_v3, inf }
 0x249   :  { %v423_v44 = vsel %vm422_vm12, %v421_v43, inf  ;;  %v985_v43 = vmov 4  }
 0x24a   :  { %372 = vrot.lane.b32.xlu1 %v370_v5, %s984_s4 }
 0x24b   :  { %829 = vset.pattern.permute.xlu1 %v985_v43 }
 0x2bc   :  { %v373_v21 = vpop.permute.xlu1 %372 }
 0x2bd   :  { %v375_v6 = vsel %vm359_vm10, %v373_v21, 0.0 }
 0x2be   :  { %376 = vadd.xlane.f32.xlu0 %v375_v6 }
 0x34b   :  { %v377_v29 = vpop.xlane.xlu0 %376 }
 0x34c   :  { %v378_v0 = vrot.slane %v377_v29, 4 }
 0x34e   :  { %v379_v30 = vadd.f32 %v378_v0, %v377_v29 }
 0x350   :  { %v380_v31 = vrot.slane %v379_v30, 2 }
 0x352   :  { %v381_v32 = vadd.f32 %v380_v31, %v379_v30 }
 0x354   :  { %v382_v33 = vrot.slane %v381_v32, 1 }
 0x356   :  { %v383_v34 = vadd.f32 %v382_v33, %v381_v32 }
 0x358   :  { %787 = vpush %v383_v34 }
 0x359   :  { %789 = vpush %v834_v35 }
 0x389   :  { %s788_s24 = spop %787 }
 0x38a   :  { %s1260_s25 = spop %789 }
 0x38b   :  { %s388_s26 = smul.f32 %s1260_s25, %s788_s24 }
 0x38d   :  { %v389_v38 = vstv %s388_s26 }
 0x38e   :  { %v390_v11 = vsub.f32 %v1254_v3, %v389_v38 }
 0x390   :  { %v391_v12 = vmul.f32 %v390_v11, %v390_v11 }
 0x392   :  { %v392_v42 = vmul.f32 %v391_v12, %v1105_v4 }
 0x394   :  { %394 = vrot.lane.b32.xlu0 %v392_v42, %s984_s4 }
 0x3b3   :  { %424 = vmin.xlane.f32.xlu0 %v423_v44 }
 0x3c9   :  { %465 = vrot.lane.b32.xlu0 %v1274_v19, %s975_s1 }
 0x406   :  { %v395_v45 = vpop.permute.xlu0 %394 }
 0x407   :  { %v397_v46 = vsel %vm359_vm10, %v395_v45, 0.0 }
 0x408   :  { %398 = vadd.xlane.f32.xlu1 %v397_v46 }
 0x440   :  { %v425_v57 = vpop.xlane.xlu0 %424 }
 0x441   :  { %v426_v58 = vrot.slane %v425_v57, 4 }
 0x443   :  { %v427_v59 = vmin.f32 %v425_v57, %v426_v58 }
 0x445   :  { %v428_v63 = vrot.slane %v427_v59, 2 }
 0x447   :  { %v429_v1 = vmin.f32 %v427_v59, %v428_v63 }
 0x449   :  { %v430_v5 = vrot.slane %v429_v1, 1 }
 0x44b   :  { %v431_v16 = vmin.f32 %v429_v1, %v430_v5 }
 0x495   :  { %v399_v47 = vpop.xlane.xlu1 %398 }
 0x496   :  { %v400_v49 = vrot.slane %v399_v47, 4 }
 0x498   :  { %v401_v50 = vadd.f32 %v400_v49, %v399_v47 }
 0x49a   :  { %v402_v51 = vrot.slane %v401_v50, 2 }
 0x49c   :  { %v403_v52 = vadd.f32 %v402_v51, %v401_v50  ;;  %v1284_v50 = vpop.permute.xlu0 %465 }
 0x49e   :  { %v404_v53 = vrot.slane %v403_v52, 1 }
 0x4a0   :  { %v405_v54 = vadd.f32 %v404_v53, %v403_v52 }
 0x4a2   :  { %791 = vpush %v405_v54 }
 0x4d3   :  { %s792_s27 = spop %791 }
 0x4d4   :  { %s410_s0 = smul.f32 %s792_s27, %s1260_s25 }
 0x4d6   :  { %v411_v61 = vstv %s410_s0 }
 0x4d7   :  { %835 = vrsqrt.f32 %v411_v61  ;;  %vm414_vm13 = vcmp.eq.f32.partialorder %v411_v61, inf  ;;  %v417_v13 = vand.u32 2147483648, %v411_v61  ;;  %vm416_vm14 = vcmp.eq.f32.partialorder %v411_v61, 0.0 }
 0x4e1   :  { %v836_v2 = vpop.eup %835 }
 0x4e2   :  { %v413_v10 = vmul.f32 %v836_v2, %v411_v61 }
 0x4e4   :  { %v415_v14 = vsel %vm414_vm13, %v411_v61, %v413_v10 }
 0x4e5   :  { %v418_v15 = vsel %vm416_vm14, %v417_v13, %v415_v14 }
 0x4e6   :  { %793 = vpush %v418_v15 }
 0x4e7   :  { %795 = vpush %v431_v16 }
 0x517   :  { %s794_s21 = spop %793 }
 0x518   :  { %p433_p4 = scmp.ne.f32.partialorder %s794_s21, 0.0  ;;  %s796_s28 = spop %795 }
 0x519   :  { %v447_v6 = vstv %s796_s28 }
 0x51a   :  { %s1406_s21 = smov (!%p433_p4, %s794_s21), 1.0  ;;  %v448_v24 = vsub.f32 %v1254_v3, %v447_v6 }
 0x51b   :  { %v435_v20 = vstv %s1406_s21 }
 0x51c   :  { %837 = vrcp.f32 %v435_v20  ;;  %v449_v29 = vand.u32 2147483647, %v448_v24 }
 0x526   :  { %v838_v21 = vpop.eup %837 }
 0x527   :  { %797 = vpush %v838_v21 }
 0x558   :  { %s798_s29 = spop %797 }
 0x559   :  { %s1408_s29 = smov (!%p433_p4, %s798_s29), 0.0 }
 0x55a   :  { %v439_v0 = vstv %s1408_s29 }
 0x55b   :  { %v440_v30 = vmul.f32 %v439_v0, %v390_v11  ;;  %v450_v31 = vmul.f32 %v449_v29, %v439_v0 }
 0x55d   :  { %v441_v32 = vmax.f32 %v440_v30, 0.0  ;;  %v451_v33 = vsub.f32 0.0, %v450_v31 }
 0x55f   :  { %v442_v34 = vsub.f32 0.0, %v441_v32  ;;  %v452_v35 = vmul.f32 0.33333334, %v451_v33 }
 0x561   :  { %v443_v38 = vmul.f32 0.5, %v442_v34  ;;  %v453_v12 = vmul.f32 1.442695, %v452_v35 }
 0x563   :  { %839 = vpow2.f32 %v453_v12  ;;  %v444_v42 = vmul.f32 1.442695, %v443_v38 }
 0x565   :  { %841 = vpow2.f32 %v444_v42 }
 0x56d   :  { %v840_v44 = vpop.eup %839 }
 0x56e   :  { %v455_v45 = vsub.f32 1.0, %v840_v44 }
 0x56f   :  { %v842_v47 = vpop.eup %841 }
 0x570   :  { %v456_v3 = vmul.f32 %v455_v45, %v1105_v4  ;;  %v446_v11 = vmul.f32 %v842_v47, %v1105_v4 }
 0x572   :  { %v458_v46 = vadd.f32 %v1274_v19, %v456_v3 }
 0x574   :  { %460 = vrot.lane.b32.xlu1 %v458_v46, %s978_s16 }
 0x578   :  { %470 = vrot.lane.b32.xlu1 %v446_v11, %s975_s1 }
 0x5e6   :  { %v461_v49 = vpop.permute.xlu1 %460 }
 0x5e7   :  { %v463_v51 = vmul.f32 %v461_v49, %v458_v46 }
 0x5e9   :  { %v468_v52 = vmul.f32 %v1284_v50, %v463_v51 }
 0x5ea   :  { %v471_v53 = vpop.permute.xlu1 %470 }
 0x5eb   :  { %v473_v54 = vadd.f32 %v471_v53, %v468_v52 }
 0x5ed   :  { %476 = vperm.xlu1 %829, %v473_v54  }
 0x66c   :  { %v477_v57 = vpop.permute.xlu1 %476 }
 0x66d   :  { %v479_v58 = vmul.f32 %v477_v57, %v1247_v60  ;;  %v480_v59 = vmul.f32 %v477_v57, %v1249_v62  ;;  %v986_v60 = vmov 1  }
 0x66e   :  { %830 = vset.pattern.permute.xlu0 %v986_v60 }
 0x66f   :  { %v481_v61 = vmax.f32 %v479_v58, 0.0  ;;  %v482_v63 = vmax.f32 %v480_v59, 0.0 }
 0x671   :  { %492 = vrot.lane.b32.xlu0 %v481_v61, %s974_s12  ;;  %484 = vrot.lane.b32.xlu1 %v481_v61, %s976_s15 }
 0x675   :  { %500 = vrot.lane.b32.xlu0 %v481_v61, %s977_s3  ;;  %486 = vrot.lane.b32.xlu1 %v482_v63, %s976_s15 }
 0x679   :  { %508 = vrot.lane.b32.xlu0 %v481_v61, %s975_s1  ;;  %494 = vrot.lane.b32.xlu1 %v482_v63, %s974_s12  ;;  %s744_s12 = sshll.u32 %s987_s2, 4  ;;  %s745_s12 = int_to_ptr.vmem [resolvable:$true] %s744_s12 }
 0x67a   :  { %s939_s13 = scalar_lea.vmem %s745_s12, 256  ;;  %p944_p7 = scmp.lt.s32.totalorder %s745_s12, %s745_s12 }
 0x67b   :  { %p940_p6 = scmp.ne.s32.totalorder %s745_s12, %s939_s13  ;;  %p945_p8 = scmp.lt.s32.totalorder %s939_s13, %s939_s13 }
 0x67d   :  { %518 = vrot.lane.b32.xlu0 %v481_v61, %s978_s16  ;;  %502 = vrot.lane.b32.xlu1 %v482_v63, %s977_s3  ;;  %p946_p9 = por %p945_p8, %p944_p7 }
 0x67f   :  { %p947_p10 = pnand %p946_p9, %p940_p6 }
 0x681   :  { %526 = vrot.lane.b32.xlu0 %v481_v61, %s981_s18  ;;  %510 = vrot.lane.b32.xlu1 %v482_v63, %s975_s1 }
 0x685   :  { %534 = vrot.lane.b32.xlu0 %v481_v61, %s979_s17  ;;  %520 = vrot.lane.b32.xlu1 %v482_v63, %s978_s16 }
 0x689   :  { %542 = vrot.lane.b32.xlu0 %v481_v61, %s983_s19  ;;  %528 = vrot.lane.b32.xlu1 %v482_v63, %s981_s18 }
 0x68d   :  { %536 = vrot.lane.b32.xlu1 %v482_v63, %s979_s17  ;;  %551 = vperm.xlu0 %830, %v1105_v4  }
 0x691   :  { %544 = vrot.lane.b32.xlu1 %v482_v63, %s983_s19  ;;  %831 = vset.pattern.permute.xlu0 %v985_v43 }
 0x6e3   :  { %v493_v62 = vpop.permute.xlu0 %492  ;;  %v485_v1 = vpop.permute.xlu1 %484 }
 0x6e7   :  { %v501_v2 = vpop.permute.xlu0 %500  ;;  %v487_v5 = vpop.permute.xlu1 %486 }
 0x6e8   :  { %v488_v10 = vsel %vm86_vm2, %v485_v1, %v487_v5  ;;  %v489_v13 = vsel %vm86_vm2, %v487_v5, %v485_v1 }
 0x6e9   :  { %v490_v21 = vmul.f32 %v489_v13, %v1142_v26  ;;  %v491_v24 = vmul.f32 %v488_v10, %v1145_v27 }
 0x6eb   :  { %v509_v14 = vpop.permute.xlu0 %508  ;;  %v495_v15 = vpop.permute.xlu1 %494 }
 0x6ec   :  { %v496_v16 = vsel %vm103_vm1, %v493_v62, %v495_v15  ;;  %v497_v20 = vsel %vm103_vm1, %v495_v15, %v493_v62 }
 0x6ed   :  { %v498_v6 = vmul.f32 %v497_v20, %v1133_v22  ;;  %v499_v29 = vmul.f32 %v496_v16, %v1136_v23 }
 0x6ef   :  { %v503_v0 = vpop.permute.xlu1 %502  ;;  %v769_v30 = vpack.c.bf16 %v499_v29, %v491_v24  ;;  %v771_v31 = vpack.c.bf16 %v498_v6, %v490_v21  ;;  %v519_v32 = vpop.permute.xlu0 %518 }
 0x6f0   :  { %v504_v33 = vsel %vm120_vm3, %v501_v2, %v503_v0  ;;  %v505_v34 = vsel %vm120_vm3, %v503_v0, %v501_v2 }
 0x6f1   :  { %770 = vmatprep.subr.bf16.mxu1 %v769_v30  ;;  %v506_v23 = vmul.f32 %v505_v34, %v1157_v36  ;;  %v507_v27 = vmul.f32 %v504_v33, %v1160_v37  ;;  %v517_v37 = vmul.f32 %v482_v63, %v1170_v41 }
 0x6f2   :  { %772 = vmatpush1.bf16.msra.mxu1 %v771_v31 }
 0x6f3   :  { %v511_v35 = vpop.permute.xlu1 %510  ;;  %v527_v42 = vpop.permute.xlu0 %526 }
 0x6f4   :  { %v512_v22 = vsel %vm137_vm0, %v509_v14, %v511_v35  ;;  %v513_v26 = vsel %vm137_vm0, %v511_v35, %v509_v14 }
 0x6f5   :  { %v514_v38 = vmul.f32 %v513_v26, %v1121_v17  ;;  %v515_v12 = vmul.f32 %v512_v22, %v1124_v18  ;;  %v516_v17 = vmul.f32 %v481_v61, %v1167_v40 }
 0x6f7   :  { %v521_v43 = vpop.permute.xlu1 %520  ;;  %v773_v44 = vpack.c.bf16 %v515_v12, %v507_v27  ;;  %v775_v45 = vpack.c.bf16 %v514_v38, %v506_v23  ;;  %v535_v51 = vpop.permute.xlu0 %534 }
 0x6f8   :  { %v522_v3 = vsel %vm167_vm5, %v519_v32, %v521_v43  ;;  %v523_v46 = vsel %vm167_vm5, %v521_v43, %v519_v32 }
 0x6f9   :  { %v524_v47 = vmul.f32 %v522_v3, %v1183_v55  ;;  %v525_v36 = vmul.f32 %v523_v46, %v1186_v56  ;;  %774 = vmatprep.subr.bf16.mxu1 %v773_v44 }
 0x6fa   :  { %776 = vmatpush1.bf16.msra.mxu1 %v775_v45 }
 0x6fb   :  { %v529_v18 = vpop.permute.xlu1 %528  ;;  %v777_v11 = vpack.c.bf16 %v525_v36, %v517_v37  ;;  %v779_v49 = vpack.c.bf16 %v524_v47, %v516_v17  ;;  %v543_v59 = vpop.permute.xlu0 %542 }
 0x6fc   :  { %v530_v52 = vsel %vm184_vm7, %v527_v42, %v529_v18  ;;  %v531_v53 = vsel %vm184_vm7, %v529_v18, %v527_v42 }
 0x6fd   :  { %778 = vmatprep.subr.bf16.mxu1 %v777_v11  ;;  %v532_v41 = vmul.f32 %v530_v52, %v1217_v25  ;;  %v533_v54 = vmul.f32 %v531_v53, %v1220_v28 }
 0x6fe   :  { %780 = vmatpush1.bf16.msra.mxu1 %v779_v49 }
 0x6ff   :  { %v537_v55 = vpop.permute.xlu1 %536 }
 0x700   :  { %v538_v56 = vsel %vm201_vm6, %v535_v51, %v537_v55  ;;  %v539_v40 = vsel %vm201_vm6, %v537_v55, %v535_v51 }
 0x701   :  { %v540_v57 = vmul.f32 %v538_v56, %v1200_v8  ;;  %v541_v58 = vmul.f32 %v539_v40, %v1203_v9  ;;  %v483_v8 = vld [vmem:[#allocation7] sm:$0xff] }
 0x703   :  { %v545_v61 = vpop.permute.xlu1 %544  ;;  %v781_v63 = vpack.c.bf16 %v541_v58, %v533_v54  ;;  %v783_v60 = vpack.c.bf16 %v540_v57, %v532_v41 }
 0x704   :  { %v547_v62 = vsel %vm218_vm8, %v545_v61, %v543_v59  ;;  %v546_v1 = vsel %vm218_vm8, %v543_v59, %v545_v61 }
 0x705   :  { %v549_v2 = vmul.f32 %v1229_v39, %v547_v62  ;;  %782 = vmatprep.subr.bf16.mxu1 %v781_v63  ;;  %v548_v25 = vmul.f32 %v1235_v48, %v546_v1 }
 0x706   :  { %784 = vmatpush1.bf16.msra.mxu1 %v783_v60 }
 0x707   :  { %574 = vmatprep.subr.mxu1 %v549_v2 }
 0x70a   :  { %575 = vmatpush1.msra.mxu1 %v548_v25 }
 0x70b   :  { %760 = vmatmul.mubr.msk.f32.vlgmr.msra.gmra.mrb[0].mxu1 %vm554_vm15, %v483_v8 }
 0x70c   :  { %v552_v9 = vpop.permute.xlu0 %551 }
 0x7de   :  { %v624_v28 = vpop.f32.mrb[0].mxu1 }
 0x7df   :  { %v1356_v5 = vadd.f32 %v624_v28, %v552_v9  ;;  %v626_v10 = vpop.f32.mrb[1].mxu1 }
 0x7e0   :  { %v1358_v13 = vadd.f32 %v626_v10, %v552_v9 }
 0x7e2   :  { %v629_v7 = vadd.f32 %v1358_v13, %v1356_v5 }
 0x7e4   :  { %630 = vadd.xlane.f32.xlu1 %v629_v7 }
 0x871   :  { %v1362_v39 = vpop.xlane.xlu1 %630 }
 0x872   :  { %v632_v48 = vmul.f32 %v1362_v39, %v1105_v4  ;;  %v682_v22 = vsel %vm420_vm11, %v1362_v39, inf }
 0x873   :  { %v683_v26 = vsel %vm422_vm12, %v682_v22, inf }
 0x874   :  { %634 = vrot.lane.b32.xlu0 %v632_v48, %s984_s4 }
 0x8e6   :  { %v635_v14 = vpop.permute.xlu0 %634 }
 0x8e7   :  { %v637_v15 = vsel %vm359_vm10, %v635_v14, 0.0 }
 0x8e8   :  { %638 = vadd.xlane.f32.xlu0 %v637_v15 }
 0x975   :  { %v639_v16 = vpop.xlane.xlu0 %638 }
 0x976   :  { %v640_v20 = vrot.slane %v639_v16, 4 }
 0x978   :  { %v641_v21 = vadd.f32 %v640_v20, %v639_v16 }
 0x97a   :  { %v642_v6 = vrot.slane %v641_v21, 2 }
 0x97c   :  { %v643_v24 = vadd.f32 %v642_v6, %v641_v21 }
 0x97e   :  { %v644_v29 = vrot.slane %v643_v24, 1 }
 0x980   :  { %v645_v0 = vadd.f32 %v644_v29, %v643_v24 }
 0x982   :  { %799 = vpush %v645_v0 }
 0x9b3   :  { %s800_s30 = spop %799 }
 0x9b4   :  { %s650_s6 = smul.f32 %s800_s30, %s1260_s25 }
 0x9b6   :  { %v651_v30 = vstv %s650_s6 }
 0x9b7   :  { %v652_v31 = vsub.f32 %v1362_v39, %v651_v30 }
 0x9b9   :  { %v653_v32 = vmul.f32 %v652_v31, %v652_v31 }
 0x9bb   :  { %v654_v33 = vmul.f32 %v653_v32, %v1105_v4 }
 0x9bd   :  { %656 = vrot.lane.b32.xlu1 %v654_v33, %s984_s4 }
 0xa2f   :  { %v657_v34 = vpop.permute.xlu1 %656 }
 0xa30   :  { %v659_v35 = vsel %vm359_vm10, %v657_v34, 0.0 }
 0xa31   :  { %660 = vadd.xlane.f32.xlu0 %v659_v35 }
 0xa35   :  { %684 = vmin.xlane.f32.xlu0 %v683_v26 }
 0xabe   :  { %v661_v23 = vpop.xlane.xlu0 %660 }
 0xabf   :  { %v662_v27 = vrot.slane %v661_v23, 4 }
 0xac1   :  { %v663_v38 = vadd.f32 %v662_v27, %v661_v23 }
 0xac2   :  { %v685_v45 = vpop.xlane.xlu0 %684 }
 0xac3   :  { %v664_v12 = vrot.slane %v663_v38, 2  ;;  %v686_v3 = vrot.slane %v685_v45, 4 }
 0xac5   :  { %v665_v42 = vadd.f32 %v664_v12, %v663_v38  ;;  %v687_v46 = vmin.f32 %v685_v45, %v686_v3 }
 0xac7   :  { %v666_v43 = vrot.slane %v665_v42, 1  ;;  %v688_v36 = vrot.slane %v687_v46, 2 }
 0xac9   :  { %v667_v44 = vadd.f32 %v666_v43, %v665_v42  ;;  %v689_v37 = vmin.f32 %v687_v46, %v688_v36 }
 0xacb   :  { %801 = vpush %v667_v44  ;;  %v690_v18 = vrot.slane %v689_v37, 1 }
 0xacd   :  { %v691_v53 = vmin.f32 %v689_v37, %v690_v18 }
 0xafc   :  { %s802_s7 = spop %801 }
 0xafd   :  { %s672_s8 = smul.f32 %s802_s7, %s1260_s25 }
 0xaff   :  { %v673_v47 = vstv %s672_s8 }
 0xb00   :  { %843 = vrsqrt.f32 %v673_v47  ;;  %vm676_vm0 = vcmp.eq.f32.partialorder %v673_v47, inf  ;;  %v679_v49 = vand.u32 2147483648, %v673_v47  ;;  %vm678_vm1 = vcmp.eq.f32.partialorder %v673_v47, 0.0 }
 0xb0a   :  { %v844_v17 = vpop.eup %843 }
 0xb0b   :  { %v675_v11 = vmul.f32 %v844_v17, %v673_v47 }
 0xb0d   :  { %v677_v51 = vsel %vm676_vm0, %v673_v47, %v675_v11 }
 0xb0e   :  { %v680_v52 = vsel %vm678_vm1, %v679_v49, %v677_v51 }
 0xb0f   :  { %803 = vpush %v680_v52 }
 0xb10   :  { %805 = vpush %v691_v53 }
 0xb40   :  { %s804_s9 = spop %803 }
 0xb41   :  { %p693_p5 = scmp.ne.f32.partialorder %s804_s9, 0.0  ;;  %s806_s10 = spop %805 }
 0xb42   :  { %v707_v40 = vstv %s806_s10 }
 0xb43   :  { %s1410_s9 = smov (!%p693_p5, %s804_s9), 1.0  ;;  %v708_v41 = vsub.f32 %v1362_v39, %v707_v40 }
 0xb44   :  { %v695_v55 = vstv %s1410_s9 }
 0xb45   :  { %845 = vrcp.f32 %v695_v55  ;;  %v709_v54 = vand.u32 2147483647, %v708_v41 }
 0xb4f   :  { %v846_v56 = vpop.eup %845 }
 0xb50   :  { %807 = vpush %v846_v56 }
 0xb81   :  { %s808_s11 = spop %807 }
 0xb82   :  { %s1412_s11 = smov (!%p693_p5, %s808_s11), 0.0 }
 0xb83   :  { %v699_v57 = vstv %s1412_s11 }
 0xb84   :  { %v700_v58 = vmul.f32 %v699_v57, %v652_v31  ;;  %v710_v59 = vmul.f32 %v709_v54, %v699_v57 }
 0xb86   :  { %v701_v61 = vmax.f32 %v700_v58, 0.0  ;;  %v711_v63 = vsub.f32 0.0, %v710_v59 }
 0xb88   :  { %v702_v60 = vsub.f32 0.0, %v701_v61  ;;  %v712_v62 = vmul.f32 0.33333334, %v711_v63 }
 0xb8a   :  { %v703_v1 = vmul.f32 0.5, %v702_v60  ;;  %v713_v2 = vmul.f32 1.442695, %v712_v62 }
 0xb8c   :  { %v704_v25 = vmul.f32 1.442695, %v703_v1  ;;  %847 = vpow2.f32 %v713_v2 }
 0xb8e   :  { %849 = vpow2.f32 %v704_v25 }
 0xb96   :  { %v848_v8 = vpop.eup %847 }
 0xb97   :  { %v715_v9 = vsub.f32 1.0, %v848_v8 }
 0xb98   :  { %v850_v28 = vpop.eup %849 }
 0xb99   :  { %v706_v10 = vmul.f32 %v850_v28, %v1105_v4  ;;  %v716_v7 = vmul.f32 %v715_v9, %v1105_v4 }
 0xb9b   :  { %725 = vrot.lane.b32.xlu1 %v706_v10, %s975_s1  ;;  %v717_v39 = vadd.f32 %v716_v7, %v1274_v19 }
 0xb9d   :  { %719 = vrot.lane.b32.xlu0 %v717_v39, %s978_s16 }
 0xc0d   :  { %v726_v16 = vpop.permute.xlu1 %725 }
 0xc0f   :  { %v720_v48 = vpop.permute.xlu0 %719 }
 0xc10   :  { %v722_v14 = vmul.f32 %v720_v48, %v717_v39 }
 0xc12   :  { %v723_v15 = vmul.f32 %v722_v14, %v1284_v50 }
 0xc14   :  { %v728_v20 = vadd.f32 %v726_v16, %v723_v15 }
 0xc16   :  { %731 = vperm.xlu1 %829, %v728_v20  }
 0xc95   :  { %v732_v21 = vpop.permute.xlu1 %731 }
 0xc96   :  { %v734_v6 = vmul.f32 %v732_v21, %v1356_v5  ;;  %v735_v4 = vmul.f32 %v732_v21, %v1358_v13 }
 0xc98   :  { %736 = vst [vmem:[#allocation10] sm:$0xff] %v734_v6  ;;  %737 = vst [vmem:[#allocation10 + $0x8] sm:$0xff] %v735_v4 }
 0xc99   :  { %950 = shalt.err (!%p947_p10)
}
 0xc9a   :  { %s951_s15 = scalar_lea.hbm %s1404_s5, 256 }
 0xc9b   :  { %p952_p11 = scmp.ne.s32.totalorder %s1404_s5, %s951_s15  ;;  %p955_p12 = scmp.lt.u32.totalorder %s951_s15, %s1404_s5 }
 0xc9d   :  { %p957_p13 = pnand %p955_p12, %p952_p11 }
 0xc9f   :  { %960 = shalt.err (!%p957_p13)
}
 0xca0   :  { %747 = dma.vmem_to_hbm [thread:$0]  %s745_s12, 256, %s1404_s5, [#allocation4]  }
 0xca1   :  { %967 = dma.done.wait [#allocation4], 256  }
 0xca2   :  { %968 = vsyncadd [#allocation4], 4294967040 }
 0xca3   :  { %751 = vsyncpa [#allocation3], 1 }
 0xca4   :  { %752 = vsyncpa [#allocation6], 1 }
 0xca5   :  { %753 = vsyncpa [#allocation9], 1 }
 0xca6   :  { %754 = vsyncpa [#allocation4], 1 }

</bundles_post_ra>
